<compile_context>
chip_gen: v7x
topology: tpu7x:2x2x1
jax: 0.10.0
libtpu: 0.0.40
codegen_flags: <defaults>
</compile_context>

<pallas_src>
import functools
import math

import numpy as np

import jax
import jax.numpy as jnp
from jax import lax
from jax.experimental import pallas as pl
from jax.experimental.pallas import tpu as pltpu


LENGTHSCALE = 0.6931471805599453   # softplus(0): gpytorch RBFKernel default init
OUTPUTSCALE = 1.0                  # plain RBFKernel (no ScaleKernel)
JITTER = 1e-3                      # gpytorch add_jitter() default
_INV_SCALE = 1.0 / (math.sqrt(2.0) * LENGTHSCALE)   # ||.||/(sqrt(2)*ls) pre-scale

# Columns (rows of x) per grid step.  A (128, 1024) f32 Kzx temp is 512 KiB,
# comfortably inside every generation's VMEM with double-buffered x/out blocks.
_TILE_N = 1024


def _round_up(a, b):
    return ((a + b - 1) // b) * b


def _default_compute_dtype():
    """bf16 Kzx/exp on bf16-native EUP/VPU chips (v6e/v7x); f32 elsewhere (v5e-)."""
    try:
        kind = jax.devices()[0].device_kind.lower()
    except Exception:
        return jnp.float32
    if any(tag in kind for tag in ("v6", "v7", "7x")):
        return jnp.bfloat16
    return jnp.float32


# ----------------------------------------------------------------------------
# Pallas kernels
# ----------------------------------------------------------------------------
def _rbf_gram_body(a_ref, bt_ref, out_ref, *, inv_scale, outputscale, jitter):
    """Kzz[i, j] = outputscale * exp(-||z_i - z_j||^2 / (2 ls^2)) + jitter * I."""
    a = a_ref[...]                                     # (M, D)
    bt = bt_ref[...]                                   # (D, M)
    m, d_in = a.shape
    nsq = jnp.zeros((m, bt.shape[1]), jnp.float32)
    for d in range(d_in):                              # static unroll, D <= 4
        diff = (a[:, d:d + 1] - bt[d:d + 1, :]) * inv_scale
        nsq = nsq - diff * diff
    k = outputscale * jnp.exp(nsq)
    row = lax.broadcasted_iota(jnp.int32, k.shape, 0)
    col = lax.broadcasted_iota(jnp.int32, k.shape, 1)
    out_ref[...] = k + jitter * (row == col).astype(jnp.float32)


def rbf_gram(z, *, lengthscale=LENGTHSCALE, outputscale=OUTPUTSCALE, jitter=JITTER):
    """Jittered (M, M) Gram of the inducing points.  Init-time only."""
    m, d = z.shape
    body = functools.partial(_rbf_gram_body,
                             inv_scale=1.0 / (math.sqrt(2.0) * float(lengthscale)),
                             outputscale=float(outputscale),
                             jitter=float(jitter))
    return pl.pallas_call(
        body,
        out_shape=jax.ShapeDtypeStruct((m, m), jnp.float32),
        grid=(1,),
        in_specs=[pl.BlockSpec((m, d), lambda i: (0, 0)),
                  pl.BlockSpec((d, m), lambda i: (0, 0))],
        out_specs=pl.BlockSpec((m, m), lambda i: (0, 0)),
        compiler_params=pltpu.CompilerParams(dimension_semantics=("arbitrary",)),
    )(z, z.T)


def _gp_layer_body(x_ref, w_ref, zs_ref, beta_ref, out_ref, *, inv_scale,
                   compute_dtype):
    """Fused per-tile, feature-major: Kzx (M, TILE_N) -> beta^T @ Kzx + W^T x.

    x_ref   : (D, TILE_N) f32        (lane-dense n tile)
    w_ref   : (1, D)      f32        (resident)
    zs_ref  : (M, D)      f32        (resident, pre-scaled by 1/(sqrt(2) ls))
    beta_ref: (P, M)      compute_dtype (resident, outputscale folded in)
    out_ref : (P, TILE_N) f32        (lane-dense output)
    """
    x = x_ref[...]
    zs = zs_ref[...]
    d_in = x.shape[0]
    # Negative scaled squared distance, accumulated directly per feature:
    # numerically safer than x2 + z2 - 2xz (no cancellation, no clamp) and the
    # VPU passes co-issue under the EUP-bound exp.
    diff = zs[:, 0:1] - x[0:1, :] * inv_scale          # (M, TILE_N)
    nsq = -(diff * diff)
    for d in range(1, d_in):                           # static unroll, D <= 4
        diff = zs[:, d:d + 1] - x[d:d + 1, :] * inv_scale
        nsq = nsq - diff * diff
    kzx = jnp.exp(nsq.astype(compute_dtype))           # EUP; bf16 on v6e/v7x
    proj = jnp.dot(beta_ref[...], kzx,
                   preferred_element_type=jnp.float32)           # (P, TILE_N)
    mean_row = jnp.dot(w_ref[...], x,
                       preferred_element_type=jnp.float32)       # (1, TILE_N)
    out_ref[...] = (proj + mean_row).astype(out_ref.dtype)


def gp_layer_mean_t(x_t, w_row, zs, beta_t, *, compute_dtype=jnp.float32):
    """f^T = W^T x^T + beta^T Kzx, tiled over n (lane axis) with a parallel grid."""
    d, n = x_t.shape
    p, m = beta_t.shape

    n_lane = _round_up(n, 128)                 # lane-dense last dim
    tile_n = min(_TILE_N, n_lane)
    if n_lane >= 4 * 128:
        # >= 4 grid steps -> >= 2 steps per TensorCore on v7x megacore, and real
        # input-prefetch / output-writeback overlap on every generation.
        tile_n = min(tile_n, _round_up(pl.cdiv(n_lane, 4), 128))
    n_pad = _round_up(n_lane, tile_n)
    if n_pad != n:
        x_t = jnp.pad(x_t, ((0, 0), (0, n_pad - n)))   # padded cols sliced off below
    grid = (n_pad // tile_n,)

    body = functools.partial(_gp_layer_body, inv_scale=float(_INV_SCALE),
                             compute_dtype=compute_dtype)
    bpe = jnp.dtype(compute_dtype).itemsize
    cost = pl.CostEstimate(
        flops=int(n_pad * m * (3 * d + 2 * p) + 2 * n_pad * d),
        transcendentals=int(n_pad * m),
        bytes_accessed=int(4 * (d * n_pad + p * n_pad + d + m * d) + bpe * m * p))

    out = pl.pallas_call(
        body,
        out_shape=jax.ShapeDtypeStruct((p, n_pad), jnp.float32),
        grid=grid,
        in_specs=[pl.BlockSpec((d, tile_n), lambda i: (0, i)),   # x tile (lane-dense)
                  pl.BlockSpec((1, d), lambda i: (0, 0)),        # W row    (resident)
                  pl.BlockSpec((m, d), lambda i: (0, 0)),        # scaled Z (resident)
                  pl.BlockSpec((p, m), lambda i: (0, 0))],       # beta^T   (resident)
        out_specs=pl.BlockSpec((p, tile_n), lambda i: (0, i)),   # lane-dense out
        compiler_params=pltpu.CompilerParams(
            dimension_semantics=("parallel",),       # megacore shard on v7x
            vmem_limit_bytes=32 * 1024 * 1024),
        cost_estimate=cost,
    )(x_t, w_row, zs, beta_t)
    return out[:, :n]


# ----------------------------------------------------------------------------
# DeepGP glue (parameter init, per-layer forward, likelihood)
# ----------------------------------------------------------------------------
def _quasirandom_grid(num, dim, bound):
    # TODO(synk): torch.quasirandom.SobolEngine has no JAX equivalent; use the
    # deterministic R_d (Kronecker) low-discrepancy sequence, which plays the
    # same role: well-separated points covering [-bound, bound]^dim.
    phi = 2.0
    for _ in range(64):
        phi = (1.0 + phi) ** (1.0 / (dim + 1))
    alpha = (1.0 / phi) ** np.arange(1, dim + 1, dtype=np.float64)
    idx = np.arange(1, num + 1, dtype=np.float64)[:, None]
    pts = np.mod(0.5 + idx * alpha[None, :], 1.0)
    return jnp.asarray((2.0 * pts - 1.0) * bound, jnp.float32)


def init_layer(key, input_dim, output_dim, grid_bound=1.0, grid_num=128):
    z = _quasirandom_grid(grid_num, input_dim, grid_bound)        # (M, D)
    # Module __init__ zero-initializes inducing_means; a small deterministic
    # perturbation keeps the Kzx @ Kzz^{-1} posterior-mean path non-trivial.
    mu = 0.1 * jax.random.normal(key, (output_dim, grid_num), jnp.float32)
    kzz = rbf_gram(z)                                             # Pallas, jittered
    # TODO(synk): Cholesky / matrix inverse has no clean Pallas equivalent; done
    # once at init on host in float64 (Kzz is x-independent), stored as f32.
    kzz_inv = jnp.asarray(np.linalg.inv(np.asarray(kzz, np.float64)), jnp.float32)
    return dict(Z=z,
                Zs=z * jnp.float32(_INV_SCALE),    # pre-scaled inducing points
                mu=mu, kzz_inv=kzz_inv,
                input_dim=input_dim, output_dim=output_dim)


def _weight_vector_t(x_t):
    """Top right singular vector of x (sign arbitrary, as in torch.svd), from x^T."""
    d = x_t.shape[0]
    if d == 1:
        return jnp.ones((1, 1), jnp.float32)
    # TODO(synk): eigendecomposition has no clean Pallas equivalent; the top
    # right singular vector comes from the tiny (d, d) Gram matrix x x^T here.
    gram = x_t @ x_t.T
    _, vecs = jnp.linalg.eigh(gram)                 # ascending eigenvalues
    return vecs[:, -1:].astype(jnp.float32)         # (d, 1)


def layer_forward_t(params, x_t, *, compute_dtype=jnp.float32):
    """Eval-mode Layer.forward on feature-major input (D, n) -> (P, n)."""
    d, _ = x_t.shape
    assert d == params["input_dim"]
    z, zs, mu, kzz_inv = params["Z"], params["Zs"], params["mu"], params["kzz_inv"]
    w = _weight_vector_t(x_t)                       # (d, 1)
    delta = mu.T - z @ w                            # (M, P)
    # TODO(synk): linear solve stays in plain JAX (tiny (M, M) @ (M, P)).
    beta = kzz_inv @ delta                          # (M, P)
    beta_t = (OUTPUTSCALE * beta).T.astype(compute_dtype)   # outputscale folded in
    return gp_layer_mean_t(x_t, w.T, zs, beta_t, compute_dtype=compute_dtype)


def gaussian_likelihood(f_mean, noise_scale=0.1):
    """Gaussian output likelihood: (mean, scale) parameterization."""
    return f_mean, jnp.full_like(f_mean, noise_scale)


def deep_gp_forward(layers, x, *, compute_dtype=None):
    """DeepGP.forward (eval mode): chain layers, then the output likelihood."""
    if compute_dtype is None:
        compute_dtype = _default_compute_dtype()
    x_t = x.T                    # single transpose at the chain boundary
    for params in layers:
        x_t = layer_forward_t(params, x_t, compute_dtype=compute_dtype)
    return gaussian_likelihood(x_t.T)


# ----------------------------------------------------------------------------
# Plain-JAX reference (same algorithm, same Kzx precision) for a sanity check.
# ----------------------------------------------------------------------------
def _layer_forward_ref(params, x_t, compute_dtype):
    z, zs, mu, kzz_inv = params["Z"], params["Zs"], params["mu"], params["kzz_inv"]
    w = _weight_vector_t(x_t)
    delta = mu.T - z @ w
    beta_t = (OUTPUTSCALE * (kzz_inv @ delta)).T.astype(compute_dtype)
    nsq = jnp.zeros((z.shape[0], x_t.shape[1]), jnp.float32)
    for d in range(x_t.shape[0]):
        diff = zs[:, d:d + 1] - x_t[d:d + 1, :] * _INV_SCALE
        nsq = nsq - diff * diff
    kzx = jnp.exp(nsq.astype(compute_dtype))
    proj = jnp.dot(beta_t, kzx, preferred_element_type=jnp.float32)
    mean_row = jnp.dot(w.T, x_t, preferred_element_type=jnp.float32)
    return proj + mean_row


def _deep_gp_forward_ref(layers, x, compute_dtype):
    x_t = x.T
    for params in layers:
        x_t = _layer_forward_ref(params, x_t, compute_dtype)
    return x_t.T


# ----------------------------------------------------------------------------
if __name__ == "__main__":
    key = jax.random.PRNGKey(0)
    k_x, k_l1, k_l2 = jax.random.split(key, 3)

    # 2048 rows -> four lane-dense tiles of 512 columns: exercises the parallel
    # n-grid with >= 2 steps per TensorCore, still a tiny (32 KiB) input.
    n = 2048
    layers = [init_layer(k_l1, input_dim=4, output_dim=3, grid_num=128),
              init_layer(k_l2, input_dim=3, output_dim=2, grid_num=128)]
    x = jax.random.normal(k_x, (n, 4), jnp.float32)

    compute_dtype = _default_compute_dtype()        # bf16 on v6e/v7x, f32 on v5e-
    mean, scale = deep_gp_forward(layers, x, compute_dtype=compute_dtype)
    mean = jax.block_until_ready(mean)
    scale = jax.block_until_ready(scale)

    assert mean.shape == (n, 2), mean.shape
    assert scale.shape == (n, 2), scale.shape
    assert bool(jnp.all(jnp.isfinite(mean)))

    # Sanity check against a plain-JAX implementation of the same algorithm at
    # the same Kzx precision (the only reduced-precision step in the kernel is
    # the bf16 Kzx/exp on v6e/v7x).  The bf16 tolerance covers residual 1-ulp
    # EUP-vs-XLA exp disagreements amplified by Kzz^{-1}.
    ref = jax.block_until_ready(_deep_gp_forward_ref(layers, x, compute_dtype))
    err = float(jnp.max(jnp.abs(mean - ref)))
    rel = 5e-2 if compute_dtype == jnp.float32 else 1e-1
    tol = rel * (1.0 + float(jnp.max(jnp.abs(ref))))
    assert err < tol, (err, tol, str(compute_dtype))

    print("KERNEL_OK")
</pallas_src>

<mosaic_0001>
module attributes {stable_mosaic.version = 11 : i64} {
  func.func @_rbf_gram_body(%arg0: i32, %arg1: memref<128x4xf32, #tpu.memory_space<vmem>>, %arg2: memref<4x128xf32, #tpu.memory_space<vmem>>, %arg3: memref<128x128xf32, #tpu.memory_space<vmem>>) attributes {dimension_semantics = [#tpu.dimension_semantics<arbitrary>], iteration_bounds = array<i64: 1>, scalar_prefetch = 0 : i64, scratch_operands = 0 : i64, tpu.core_type = #tpu.core_type<tc>, window_params = [{pipeline_mode = #tpu.pipeline_mode<synchronous>, transform_indices = @transform_0, window_bounds = array<i64: 128, 4>}, {pipeline_mode = #tpu.pipeline_mode<synchronous>, transform_indices = @transform_1, window_bounds = array<i64: 4, 128>}, {pipeline_mode = #tpu.pipeline_mode<synchronous>, transform_indices = @transform_2, window_bounds = array<i64: 128, 128>}]} {
    %c0 = arith.constant 0 : index
    %c0_0 = arith.constant 0 : index
    %0 = vector.load %arg1[%c0, %c0_0] : memref<128x4xf32, #tpu.memory_space<vmem>>, vector<128x4xf32>
    %c0_1 = arith.constant 0 : index
    %c0_2 = arith.constant 0 : index
    %1 = vector.load %arg2[%c0_1, %c0_2] : memref<4x128xf32, #tpu.memory_space<vmem>>, vector<4x128xf32>
    %cst = arith.constant 0.000000e+00 : f32
    %2 = vector.broadcast %cst : f32 to vector<128x128xf32>
    %3 = vector.extract_strided_slice %0 {offsets = [0, 0], sizes = [128, 1], strides = [1, 1]} : vector<128x4xf32> to vector<128x1xf32>
    %4 = vector.extract_strided_slice %1 {offsets = [0, 0], sizes = [1, 128], strides = [1, 1]} : vector<4x128xf32> to vector<1x128xf32>
    %5 = vector.broadcast %3 : vector<128x1xf32> to vector<128x128xf32>
    %6 = vector.broadcast %4 : vector<1x128xf32> to vector<128x128xf32>
    %7 = arith.subf %5, %6 : vector<128x128xf32>
    %cst_3 = arith.constant 1.02013946 : f32
    %8 = vector.broadcast %cst_3 : f32 to vector<128x128xf32>
    %9 = arith.mulf %7, %8 : vector<128x128xf32>
    %10 = arith.mulf %9, %9 : vector<128x128xf32>
    %11 = arith.subf %2, %10 : vector<128x128xf32>
    %12 = vector.extract_strided_slice %0 {offsets = [0, 1], sizes = [128, 1], strides = [1, 1]} : vector<128x4xf32> to vector<128x1xf32>
    %13 = vector.extract_strided_slice %1 {offsets = [1, 0], sizes = [1, 128], strides = [1, 1]} : vector<4x128xf32> to vector<1x128xf32>
    %14 = vector.broadcast %12 : vector<128x1xf32> to vector<128x128xf32>
    %15 = vector.broadcast %13 : vector<1x128xf32> to vector<128x128xf32>
    %16 = arith.subf %14, %15 : vector<128x128xf32>
    %cst_4 = arith.constant 1.02013946 : f32
    %17 = vector.broadcast %cst_4 : f32 to vector<128x128xf32>
    %18 = arith.mulf %16, %17 : vector<128x128xf32>
    %19 = arith.mulf %18, %18 : vector<128x128xf32>
    %20 = arith.subf %11, %19 : vector<128x128xf32>
    %21 = vector.extract_strided_slice %0 {offsets = [0, 2], sizes = [128, 1], strides = [1, 1]} : vector<128x4xf32> to vector<128x1xf32>
    %22 = vector.extract_strided_slice %1 {offsets = [2, 0], sizes = [1, 128], strides = [1, 1]} : vector<4x128xf32> to vector<1x128xf32>
    %23 = vector.broadcast %21 : vector<128x1xf32> to vector<128x128xf32>
    %24 = vector.broadcast %22 : vector<1x128xf32> to vector<128x128xf32>
    %25 = arith.subf %23, %24 : vector<128x128xf32>
    %cst_5 = arith.constant 1.02013946 : f32
    %26 = vector.broadcast %cst_5 : f32 to vector<128x128xf32>
    %27 = arith.mulf %25, %26 : vector<128x128xf32>
    %28 = arith.mulf %27, %27 : vector<128x128xf32>
    %29 = arith.subf %20, %28 : vector<128x128xf32>
    %30 = vector.extract_strided_slice %0 {offsets = [0, 3], sizes = [128, 1], strides = [1, 1]} : vector<128x4xf32> to vector<128x1xf32>
    %31 = vector.extract_strided_slice %1 {offsets = [3, 0], sizes = [1, 128], strides = [1, 1]} : vector<4x128xf32> to vector<1x128xf32>
    %32 = vector.broadcast %30 : vector<128x1xf32> to vector<128x128xf32>
    %33 = vector.broadcast %31 : vector<1x128xf32> to vector<128x128xf32>
    %34 = arith.subf %32, %33 : vector<128x128xf32>
    %cst_6 = arith.constant 1.02013946 : f32
    %35 = vector.broadcast %cst_6 : f32 to vector<128x128xf32>
    %36 = arith.mulf %34, %35 : vector<128x128xf32>
    %37 = arith.mulf %36, %36 : vector<128x128xf32>
    %38 = arith.subf %29, %37 : vector<128x128xf32>
    %39 = math.exp %38 : vector<128x128xf32>
    %cst_7 = arith.constant 1.000000e+00 : f32
    %40 = vector.broadcast %cst_7 : f32 to vector<128x128xf32>
    %41 = arith.mulf %40, %39 : vector<128x128xf32>
    %42 = tpu.iota {dimensions = array<i32: 0>} : vector<128x128xi32>
    %43 = tpu.iota {dimensions = array<i32: 1>} : vector<128x128xi32>
    %44 = arith.cmpi eq, %42, %43 : vector<128x128xi32>
    %45 = arith.extui %44 : vector<128x128xi1> to vector<128x128xi32>
    %46 = arith.sitofp %45 : vector<128x128xi32> to vector<128x128xf32>
    %cst_8 = arith.constant 1.000000e-03 : f32
    %47 = vector.broadcast %cst_8 : f32 to vector<128x128xf32>
    %48 = arith.mulf %47, %46 : vector<128x128xf32>
    %49 = arith.addf %41, %48 : vector<128x128xf32>
    %c0_9 = arith.constant 0 : index
    %c0_10 = arith.constant 0 : index
    %50 = vector.load %arg3[%c0_9, %c0_10] : memref<128x128xf32, #tpu.memory_space<vmem>>, vector<128x128xf32>
    tpu.vector_store %arg3[%c0_9, %c0_10], %49 {strides = array<i32>} : memref<128x128xf32, #tpu.memory_space<vmem>>, vector<128x128xf32>,
    return
  }
  func.func @transform_0(%arg0: i32) -> (i32, i32) {
    %c0_i32 = arith.constant 0 : i32
    %c0_i32_0 = arith.constant 0 : i32
    %c0_i32_1 = arith.constant 0 : i32
    return %c0_i32, %c0_i32_0 : i32, i32
  }
  func.func @transform_1(%arg0: i32) -> (i32, i32) {
    %c0_i32 = arith.constant 0 : i32
    %c0_i32_0 = arith.constant 0 : i32
    %c0_i32_1 = arith.constant 0 : i32
    return %c0_i32, %c0_i32_0 : i32, i32
  }
  func.func @transform_2(%arg0: i32) -> (i32, i32) {
    %c0_i32 = arith.constant 0 : i32
    %c0_i32_0 = arith.constant 0 : i32
    %c0_i32_1 = arith.constant 0 : i32
    return %c0_i32, %c0_i32_0 : i32, i32
  }
}

</mosaic_0001>

<bundles_post_ra>
// kernel: tpu_custom_call.1
= control target key start
LH: loop header
LB: loop body
LE: loop exit
PB: predicated region body
PF: predicated region fallthrough
CT: control target
= control target key end

     0   :  { %v824_v2 = vmov 0   ;;  %s1329_s0 = inlined_call_operand.vmem [shape: f32[128,4], index: 0, kind: input, shape index: {}]   ;;  %s1330_s1 = inlined_call_operand.vmem [shape: f32[4,128], index: 1, kind: input, shape index: {}]   ;;  %s1331_s2 = inlined_call_operand.hbm [shape: f32[128,128], index: 2, kind: output, shape index: {}]  }
   0x1   :  { %v850_v0 = vld [vmem:[%s1329_s0 + $0x10] sm:$0xff]  ;;  %v855_v1 = vld [vmem:[%s1329_s0] sm:$0xff]  ;;  %761 = vset.pattern.permute.xlu1 %v824_v2  ;;  %760 = vset.pattern.permute.xlu0 %v824_v2  ;;  %v862_v3 = vld [vmem:[%s1329_s0 + $0x18] sm:$0xff] }
   0x2   :  { %41 = vperm.xlu1 %761, %v850_v0   ;;  %31 = vperm.xlu0 %760, %v855_v1   ;;  %v867_v4 = vld [vmem:[%s1329_s0 + $0x8] sm:$0xff] }
   0x3   :  { %7 = vsyncpa [#allocation3], 0  ;;  %v874_v5 = vld [vmem:[%s1329_s0 + $0x28] sm:$0xff]  ;;  %v879_v6 = vld [vmem:[%s1329_s0 + $0x20] sm:$0xff]  ;;  %v825_v17 = vmov 1   ;;  %v826_v18 = vmov 2   ;;  %v109_v26 = vlaneseq }
   0x4   :  { %v886_v7 = vld [vmem:[%s1329_s0 + $0x38] sm:$0xff]  ;;  %v891_v8 = vld [vmem:[%s1329_s0 + $0x30] sm:$0xff]  ;;  %v898_v9 = vld [vmem:[%s1329_s0 + $0x48] sm:$0xff]  ;;  %v827_v19 = vmov 3  }
   0x5   :  { %v903_v10 = vld [vmem:[%s1329_s0 + $0x40] sm:$0xff]  ;;  %v23_v11 = vld [vmem:[%s1329_s0 + $0x58] sm:$0xff]  ;;  %v913_v12 = vld [vmem:[%s1329_s0 + $0x50] sm:$0xff]  ;;  %v970_v29 = vshrl.u32 %v109_v26, 7 }
   0x6   :  { %46 = vperm.xlu1 %761, %v862_v3   ;;  %36 = vperm.xlu0 %760, %v867_v4   ;;  %v25_v13 = vld [vmem:[%s1329_s0 + $0x68] sm:$0xff]  ;;  %v24_v14 = vld [vmem:[%s1329_s0 + $0x60] sm:$0xff]  ;;  %v27_v15 = vld [vmem:[%s1329_s0 + $0x78] sm:$0xff] }
   0x7   :  { %v26_v16 = vld [vmem:[%s1329_s0 + $0x70] sm:$0xff]  ;;  %1336 = vst [vmem:[#allocation5_spill] sm:$0xff] %v970_v29  ;;  %v111_v32 = vsub.s32 0, %v970_v29  ;;  %v978_v33 = vld [vmem:[%s1330_s1] sm:$0xf]  ;;  %v243_v40 = vsub.s32 1, %v970_v29 }
   0x8   :  { %s829_s1 = smov [#allocation2]  }
   0x9   :  { %v983_v36 = vrot.slane %v978_v33, %v111_v32  ;;  %v995_v45 = vrot.slane %v978_v33, %v243_v40  ;;  %s725_s14 = sshll.u32 %s829_s1, 4  ;;  %s726_s14 = int_to_ptr.vmem [resolvable:$true] %s725_s14 }
   0xa   :  { %56 = vperm.xlu1 %761, %v874_v5   ;;  %51 = vperm.xlu0 %760, %v879_v6   ;;  %s800_s15 = scalar_lea.vmem %s726_s14, 2048  ;;  %p805_p1 = scmp.lt.s32.totalorder %s726_s14, %s726_s14 }
   0xb   :  { %p801_p0 = scmp.ne.s32.totalorder %s726_s14, %s800_s15  ;;  %p806_p2 = scmp.lt.s32.totalorder %s800_s15, %s800_s15 }
   0xd   :  { %p807_p3 = por %p806_p2, %p805_p1 }
   0xe   :  { %66 = vperm.xlu1 %761, %v886_v7   ;;  %61 = vperm.xlu0 %760, %v891_v8  }
   0xf   :  { %p808_p4 = pnand %p807_p3, %p801_p0 }
  0x12   :  { %76 = vperm.xlu1 %761, %v898_v9   ;;  %71 = vperm.xlu0 %760, %v903_v10  }
  0x16   :  { %86 = vperm.xlu1 %761, %v23_v11   ;;  %81 = vperm.xlu0 %760, %v913_v12  }
  0x1a   :  { %96 = vperm.xlu1 %761, %v25_v13   ;;  %91 = vperm.xlu0 %760, %v24_v14  }
  0x1e   :  { %106 = vperm.xlu1 %761, %v27_v15   ;;  %101 = vperm.xlu0 %760, %v26_v16  }
  0x22   :  { %763 = vset.pattern.permute.xlu1 %v825_v17  ;;  %762 = vset.pattern.permute.xlu0 %v825_v17 }
  0x23   :  { %182 = vperm.xlu1 %763, %v867_v4   ;;  %178 = vperm.xlu0 %762, %v855_v1  }
  0x27   :  { %186 = vperm.xlu1 %763, %v850_v0   ;;  %190 = vperm.xlu0 %762, %v862_v3  }
  0x2b   :  { %194 = vperm.xlu1 %763, %v879_v6   ;;  %198 = vperm.xlu0 %762, %v874_v5  }
  0x2f   :  { %202 = vperm.xlu1 %763, %v891_v8   ;;  %206 = vperm.xlu0 %762, %v886_v7  }
  0x33   :  { %210 = vperm.xlu1 %763, %v903_v10   ;;  %214 = vperm.xlu0 %762, %v898_v9  }
  0x37   :  { %218 = vperm.xlu1 %763, %v913_v12   ;;  %222 = vperm.xlu0 %762, %v23_v11  }
  0x3b   :  { %226 = vperm.xlu1 %763, %v24_v14   ;;  %230 = vperm.xlu0 %762, %v25_v13  }
  0x3f   :  { %234 = vperm.xlu1 %763, %v26_v16   ;;  %238 = vperm.xlu0 %762, %v27_v15  }
  0x43   :  { %764 = vset.pattern.permute.xlu1 %v826_v18  ;;  %765 = vset.pattern.permute.xlu0 %v826_v18 }
  0x44   :  { %310 = vperm.xlu1 %764, %v855_v1   ;;  %314 = vperm.xlu0 %765, %v867_v4  }
  0x48   :  { %318 = vperm.xlu1 %764, %v850_v0   ;;  %326 = vperm.xlu0 %765, %v879_v6  }
  0x4c   :  { %322 = vperm.xlu1 %764, %v862_v3   ;;  %334 = vperm.xlu0 %765, %v891_v8  }
  0x50   :  { %330 = vperm.xlu1 %764, %v874_v5   ;;  %342 = vperm.xlu0 %765, %v903_v10  }
  0x54   :  { %338 = vperm.xlu1 %764, %v886_v7   ;;  %350 = vperm.xlu0 %765, %v913_v12  }
  0x58   :  { %346 = vperm.xlu1 %764, %v898_v9   ;;  %358 = vperm.xlu0 %765, %v24_v14  }
  0x5c   :  { %354 = vperm.xlu1 %764, %v23_v11   ;;  %366 = vperm.xlu0 %765, %v26_v16  }
  0x60   :  { %362 = vperm.xlu1 %764, %v25_v13   ;;  %766 = vset.pattern.permute.xlu0 %v827_v19 }
  0x61   :  { %442 = vperm.xlu0 %766, %v855_v1  }
  0x64   :  { %370 = vperm.xlu1 %764, %v27_v15  }
  0x65   :  { %454 = vperm.xlu0 %766, %v862_v3  }
  0x68   :  { %767 = vset.pattern.permute.xlu1 %v827_v19 }
  0x69   :  { %446 = vperm.xlu1 %767, %v867_v4   ;;  %462 = vperm.xlu0 %766, %v874_v5  }
  0x6d   :  { %450 = vperm.xlu1 %767, %v850_v0   ;;  %470 = vperm.xlu0 %766, %v886_v7  }
  0x71   :  { %458 = vperm.xlu1 %767, %v879_v6   ;;  %478 = vperm.xlu0 %766, %v898_v9  }
  0x75   :  { %466 = vperm.xlu1 %767, %v891_v8   ;;  %486 = vperm.xlu0 %766, %v23_v11  }
  0x79   :  { %474 = vperm.xlu1 %767, %v903_v10   ;;  %494 = vperm.xlu0 %766, %v25_v13  }
  0x7d   :  { %482 = vperm.xlu1 %767, %v913_v12   ;;  %502 = vperm.xlu0 %766, %v27_v15  }
  0x81   :  { %v42_v20 = vpop.permute.xlu1 %41  ;;  %490 = vperm.xlu1 %767, %v24_v14   ;;  %v961_v21 = vpop.permute.xlu0 %31 }
  0x82   :  { %v115_v43 = vsub.f32 %v42_v20, %v983_v36 }
  0x84   :  { %v131_v46 = vmul.f32 1.0201395, %v115_v43 }
  0x85   :  { %v963_v22 = vpop.permute.xlu1 %46  ;;  %498 = vperm.xlu1 %767, %v26_v16   ;;  %v37_v23 = vpop.permute.xlu0 %36 }
  0x86   :  { %v114_v39 = vsub.f32 %v37_v23, %v983_v36  ;;  %v147_v53 = vmul.f32 %v131_v46, %v131_v46 }
  0x88   :  { %v130_v44 = vmul.f32 1.0201395, %v114_v39  ;;  %v163_v63 = vsub.f32 0.0, %v147_v53 }
  0x89   :  { %v965_v24 = vpop.permute.xlu1 %56  ;;  %v52_v25 = vpop.permute.xlu0 %51 }
  0x8a   :  { %v146_v47 = vmul.f32 %v130_v44, %v130_v44  ;;  %v117_v50 = vsub.f32 %v52_v25, %v983_v36 }
  0x8c   :  { %v162_v54 = vsub.f32 0.0, %v146_v47  ;;  %v133_v57 = vmul.f32 1.0201395, %v117_v50 }
  0x8d   :  { %v967_v27 = vpop.permute.xlu1 %66  ;;  %v62_v28 = vpop.permute.xlu0 %61 }
  0x8e   :  { %v119_v58 = vsub.f32 %v62_v28, %v983_v36  ;;  %v149_v3 = vmul.f32 %v133_v57, %v133_v57 }
  0x90   :  { %v135_v4 = vmul.f32 1.0201395, %v119_v58  ;;  %v165_v13 = vsub.f32 0.0, %v149_v3  ;;  %v1040_v3 = vand.u32 127, %v109_v26 }
  0x91   :  { %v972_v30 = vpop.permute.xlu1 %76  ;;  %v72_v31 = vpop.permute.xlu0 %71 }
  0x92   :  { %v121_v0 = vsub.f32 %v72_v31, %v983_v36  ;;  %v151_v14 = vmul.f32 %v135_v4, %v135_v4  ;;  %vm624_vm0 = vcmp.eq.s32.totalorder %v970_v29, %v1040_v3 }
  0x94   :  { %v137_v9 = vmul.f32 1.0201395, %v121_v0  ;;  %v167_v28 = vsub.f32 0.0, %v151_v14 }
  0x95   :  { %v980_v34 = vpop.permute.xlu1 %86  ;;  %v82_v35 = vpop.permute.xlu0 %81 }
  0x96   :  { %v123_v10 = vsub.f32 %v82_v35, %v983_v36  ;;  %v153_v19 = vmul.f32 %v137_v9, %v137_v9  ;;  %v609_v9 = vadd.s32 24, %v970_v29 }
  0x98   :  { %v139_v20 = vmul.f32 1.0201395, %v123_v10  ;;  %v169_v43 = vsub.f32 0.0, %v153_v19  ;;  %v607_v10 = vadd.s32 8, %v970_v29  ;;  %vm627_vm1 = vcmp.eq.s32.totalorder %v609_v9, %v1040_v3 }
  0x99   :  { %v985_v37 = vpop.permute.xlu1 %96  ;;  %v92_v38 = vpop.permute.xlu0 %91 }
  0x9a   :  { %v125_v31 = vsub.f32 %v92_v38, %v983_v36  ;;  %v155_v44 = vmul.f32 %v139_v20, %v139_v20  ;;  %vm625_vm2 = vcmp.eq.s32.totalorder %v607_v10, %v1040_v3  ;;  %v613_v20 = vadd.s32 56, %v970_v29 }
  0x9c   :  { %vm631_vm5 = vcmp.eq.s32.totalorder %v613_v20, %v1040_v3 }
  0x9d   :  { %v989_v41 = vpop.permute.xlu1 %106  ;;  %v991_v42 = vpop.permute.xlu0 %101 }
  0x9e   :  { %v127_v50 = vsub.f32 %v991_v42, %v983_v36 }
  0xa2   :  { %v183_v48 = vpop.permute.xlu1 %182  ;;  %v997_v49 = vpop.permute.xlu0 %178 }
  0xa3   :  { %v246_v51 = vsub.f32 %v183_v48, %v995_v45  ;;  %v141_v48 = vmul.f32 1.0201395, %v125_v31  ;;  %v610_v31 = vadd.s32 32, %v970_v29 }
  0xa5   :  { %v262_v52 = vmul.f32 1.0201395, %v246_v51  ;;  %v157_v58 = vmul.f32 %v141_v48, %v141_v48  ;;  %vm628_vm6 = vcmp.eq.s32.totalorder %v610_v31, %v1040_v3 }
  0xa6   :  { %v187_v55 = vpop.permute.xlu1 %186  ;;  %v1001_v56 = vpop.permute.xlu0 %190 }
  0xa7   :  { %v278_v59 = vmul.f32 %v262_v52, %v262_v52  ;;  %v247_v60 = vsub.f32 %v187_v55, %v995_v45  ;;  %v173_v4 = vsub.f32 0.0, %v157_v58 }
  0xa9   :  { %v1005_v61 = vsub.f32 %v162_v54, %v278_v59  ;;  %v263_v62 = vmul.f32 1.0201395, %v247_v60  ;;  %v171_v54 = vsub.f32 0.0, %v155_v44  ;;  %v143_v59 = vmul.f32 1.0201395, %v127_v50 }
  0xaa   :  { %v195_v1 = vpop.permute.xlu1 %194  ;;  %v1008_v2 = vpop.permute.xlu0 %198  ;;  %v507_v44 = vsub.s32 3, %v970_v29 }
  0xab   :  { %v279_v5 = vmul.f32 %v263_v62, %v263_v62  ;;  %v249_v6 = vsub.f32 %v195_v1, %v995_v45 }
  0xad   :  { %v1011_v7 = vsub.f32 %v163_v63, %v279_v5  ;;  %v265_v8 = vmul.f32 1.0201395, %v249_v6  ;;  %v159_v5 = vmul.f32 %v143_v59, %v143_v59 }
  0xae   :  { %v203_v11 = vpop.permute.xlu1 %202  ;;  %v1014_v12 = vpop.permute.xlu0 %206 }
  0xaf   :  { %v281_v15 = vmul.f32 %v265_v8, %v265_v8  ;;  %v251_v16 = vsub.f32 %v203_v11, %v995_v45  ;;  %v611_v11 = vadd.s32 40, %v970_v29 }
  0xb1   :  { %v1017_v17 = vsub.f32 %v165_v13, %v281_v15  ;;  %v267_v18 = vmul.f32 1.0201395, %v251_v16  ;;  %v608_v15 = vadd.s32 16, %v970_v29  ;;  %v175_v16 = vsub.f32 0.0, %v159_v5 }
  0xb2   :  { %v211_v23 = vpop.permute.xlu1 %210  ;;  %v1019_v25 = vpop.permute.xlu0 %214  ;;  %vm629_vm3 = vcmp.eq.s32.totalorder %v611_v11, %v1040_v3 }
  0xb3   :  { %v283_v32 = vmul.f32 %v267_v18, %v267_v18  ;;  %v253_v35 = vsub.f32 %v211_v23, %v995_v45  ;;  %v113_v23 = vsub.f32 %v961_v21, %v983_v36  ;;  %vm626_vm4 = vcmp.eq.s32.totalorder %v608_v15, %v1040_v3 }
  0xb4   :  { %v124_v15 = vsub.f32 %v980_v34, %v983_v36  ;;  %v128_v34 = vsub.f32 %v989_v41, %v983_v36 }
  0xb5   :  { %v1023_v39 = vsub.f32 %v167_v28, %v283_v32  ;;  %v269_v40 = vmul.f32 1.0201395, %v253_v35  ;;  %v615_v32 = vadd.s32 72, %v970_v29  ;;  %v375_v35 = vsub.s32 2, %v970_v29 }
  0xb6   :  { %v219_v46 = vpop.permute.xlu1 %218  ;;  %v1025_v47 = vpop.permute.xlu0 %222 }
  0xb7   :  { %v285_v51 = vmul.f32 %v269_v40, %v269_v40  ;;  %v255_v52 = vsub.f32 %v219_v46, %v995_v45  ;;  %v1332_v46 = vmov 0.0   ;;  %vm633_vm7 = vcmp.eq.s32.totalorder %v615_v32, %v1040_v3 }
  0xb8   :  { %v736_v48 = vsel %vm624_vm0, 1.0, %v1332_v46  ;;  %v739_v21 = vsel %vm627_vm1, 1.0, %v1332_v46  ;;  %v737_v50 = vsel %vm625_vm2, 1.0, %v1332_v46  ;;  %v743_v5 = vsel %vm631_vm5, 1.0, %v1332_v46 }
  0xb9   :  { %v1030_v53 = vsub.f32 %v169_v43, %v285_v51  ;;  %v271_v38 = vmul.f32 1.0201395, %v255_v52  ;;  %v741_v51 = vsel %vm629_vm3, 1.0, %v1332_v46  ;;  %v738_v52 = vsel %vm626_vm4, 1.0, %v1332_v46 }
  0xba   :  { %v227_v55 = vpop.permute.xlu1 %226  ;;  %v1032_v57 = vpop.permute.xlu0 %230  ;;  %v1082_v58 = vmul.f32 0.001, %v736_v48  ;;  %v1084_v59 = vmul.f32 0.001, %v739_v21  ;;  %v1104_v9 = vmul.f32 0.001, %v738_v52  ;;  %v1123_v32 = vrot.slane %v978_v33, %v507_v44 }
  0xbb   :  { %v287_v60 = vmul.f32 %v271_v38, %v271_v38  ;;  %v257_v62 = vsub.f32 %v227_v55, %v995_v45  ;;  %v129_v38 = vmul.f32 1.0201395, %v113_v23  ;;  %v612_v55 = vadd.s32 48, %v970_v29 }
  0xbc   :  { %v745_v11 = vsel %vm633_vm7, 1.0, %v1332_v46  ;;  %v245_v52 = vsub.f32 %v997_v49, %v995_v45 }
  0xbd   :  { %v1035_v63 = vsub.f32 %v171_v54, %v287_v60  ;;  %v273_v0 = vmul.f32 1.0201395, %v257_v62  ;;  %v116_v54 = vsub.f32 %v963_v22, %v983_v36  ;;  %v617_v60 = vadd.s32 88, %v970_v29 }
  0xbe   :  { %v235_v1 = vpop.permute.xlu1 %234  ;;  %v1037_v42 = vpop.permute.xlu0 %238  ;;  %v118_v62 = vsub.f32 %v965_v24, %v983_v36  ;;  %v740_v24 = vsel %vm628_vm6, 1.0, %v1332_v46  ;;  %v1107_v10 = vmul.f32 %v129_v38, %v129_v38  ;;  %vm630_vm8 = vcmp.eq.s32.totalorder %v612_v55, %v1040_v3 }
  0xbf   :  { %v289_v6 = vmul.f32 %v273_v0, %v273_v0  ;;  %v259_v8 = vsub.f32 %v235_v1, %v995_v45  ;;  %v120_v0 = vsub.f32 %v967_v27, %v983_v36  ;;  %v132_v27 = vmul.f32 1.0201395, %v116_v54 }
  0xc0   :  { %vm635_vm9 = vcmp.eq.s32.totalorder %v617_v60, %v1040_v3  ;;  %v1131_v48 = vmul.f32 0.001, %v745_v11  ;;  %v742_v21 = vsel %vm630_vm8, 1.0, %v1332_v46  ;;  %v140_v38 = vmul.f32 1.0201395, %v124_v15 }
  0xc1   :  { %v1046_v13 = vsub.f32 %v173_v4, %v289_v6  ;;  %v275_v14 = vmul.f32 1.0201395, %v259_v8  ;;  %v1096_v4 = vmul.f32 0.001, %v737_v50  ;;  %v1100_v6 = vrot.slane %v978_v33, %v375_v35 }
  0xc2   :  { %v1102_v8 = vmul.f32 0.001, %v741_v51  ;;  %v136_v20 = vmul.f32 1.0201395, %v120_v0  ;;  %v1125_v35 = vmul.f32 0.001, %v740_v24  ;;  %v148_v51 = vmul.f32 %v132_v27, %v132_v27 }
  0xc3   :  { %v291_v18 = vmul.f32 %v275_v14, %v275_v14  ;;  %v1049_v26 = vpop.permute.xlu1 %310  ;;  %v1051_v19 = vpop.permute.xlu0 %314  ;;  %v122_v14 = vsub.f32 %v972_v30, %v983_v36  ;;  %v126_v30 = vsub.f32 %v985_v37, %v983_v36  ;;  %1339 = vst [vmem:[#allocation8_spill] sm:$0xff] %v1131_v48  ;;  %v161_v50 = vsub.f32 0.0, %v1107_v10 }
  0xc4   :  { %1338 = vst [vmem:[#allocation7_spill] sm:$0xff] %v1125_v35  ;;  %v747_v33 = vsel %vm635_vm9, 1.0, %v1332_v46  ;;  %v1139_v54 = vadd.s32 64, %v970_v29  ;;  %v1142_v37 = vadd.s32 104, %v970_v29  ;;  %v152_v41 = vmul.f32 %v136_v20, %v136_v20 }
  0xc5   :  { %v1061_v28 = vsub.f32 %v175_v16, %v291_v18  ;;  %v1115_v16 = vmul.f32 0.001, %v743_v5  ;;  %v134_v18 = vmul.f32 1.0201395, %v118_v62  ;;  %v138_v44 = vmul.f32 1.0201395, %v122_v14 }
  0xc6   :  { %v248_v55 = vsub.f32 %v1001_v56, %v995_v45  ;;  %v1150_v49 = vmul.f32 0.001, %v742_v21  ;;  %v142_v0 = vmul.f32 1.0201395, %v126_v30  ;;  %v144_v5 = vmul.f32 1.0201395, %v128_v34 }
  0xc7   :  { %1337 = vst [vmem:[#allocation6_spill] sm:$0xff] %v1061_v28  ;;  %v1067_v40 = vpop.permute.xlu1 %318  ;;  %v1069_v43 = vpop.permute.xlu0 %326  ;;  %v150_v36 = vmul.f32 %v134_v18, %v134_v18  ;;  %v250_v24 = vsub.f32 %v1008_v2, %v995_v45  ;;  %v252_v10 = vsub.f32 %v1014_v12, %v995_v45  ;;  %v164_v27 = vsub.f32 0.0, %v148_v51 }
  0xc8   :  { %1340 = vst [vmem:[#allocation9_spill] sm:$0xff] %v1150_v49  ;;  %v261_v11 = vmul.f32 1.0201395, %v245_v52  ;;  %v254_v14 = vsub.f32 %v1019_v25, %v995_v45  ;;  %v1158_v56 = vmul.f32 0.001, %v747_v33  ;;  %v154_v15 = vmul.f32 %v138_v44, %v138_v44 }
  0xc9   :  { %v156_v18 = vmul.f32 %v140_v38, %v140_v38  ;;  %v256_v20 = vsub.f32 %v1025_v47, %v995_v45  ;;  %v1163_v30 = vadd.s32 80, %v970_v29  ;;  %v166_v34 = vsub.f32 0.0, %v150_v36 }
  0xca   :  { %1341 = vst [vmem:[#allocation10_spill] sm:$0xff] %v1158_v56  ;;  %v168_v2 = vsub.f32 0.0, %v152_v41  ;;  %v264_v21 = vmul.f32 1.0201395, %v248_v55  ;;  %v258_v12 = vsub.f32 %v1032_v57, %v995_v45  ;;  %v158_v25 = vmul.f32 %v142_v0, %v142_v0 }
  0xcb   :  { %v1092_v1 = vpop.permute.xlu1 %322  ;;  %v1094_v22 = vpop.permute.xlu0 %334  ;;  %1342 = vst [vmem:[#allocation11_spill] sm:$0xff] %v1163_v30  ;;  %v160_v33 = vmul.f32 %v144_v5, %v144_v5  ;;  %v266_v44 = vmul.f32 1.0201395, %v250_v24  ;;  %v268_v38 = vmul.f32 1.0201395, %v252_v10  ;;  %v277_v46 = vmul.f32 %v261_v11, %v261_v11 }
  0xcc   :  { %v270_v56 = vmul.f32 1.0201395, %v254_v14  ;;  %v260_v47 = vsub.f32 %v1037_v42, %v995_v45  ;;  %v377_v36 = vsub.f32 %v1049_v26, %v1100_v6  ;;  %v170_v41 = vsub.f32 0.0, %v154_v15 }
  0xcd   :  { %v172_v55 = vsub.f32 0.0, %v156_v18  ;;  %v272_v49 = vmul.f32 1.0201395, %v256_v20  ;;  %v378_v57 = vsub.f32 %v1051_v19, %v1100_v6  ;;  %v280_v28 = vmul.f32 %v264_v21, %v264_v21 }
  0xce   :  { %v274_v30 = vmul.f32 1.0201395, %v258_v12  ;;  %v379_v0 = vsub.f32 %v1067_v40, %v1100_v6  ;;  %v380_v5 = vsub.f32 %v1092_v1, %v1100_v6  ;;  %v174_v42 = vsub.f32 0.0, %v158_v25 }
  0xcf   :  { %v1118_v23 = vpop.permute.xlu1 %330  ;;  %v1120_v31 = vpop.permute.xlu0 %342  ;;  %v176_v26 = vsub.f32 0.0, %v160_v33  ;;  %v282_v10 = vmul.f32 %v266_v44, %v266_v44  ;;  %v284_v11 = vmul.f32 %v268_v38, %v268_v38  ;;  %v293_v14 = vsub.f32 %v161_v50, %v277_v46 }
  0xd0   :  { %v286_v15 = vmul.f32 %v270_v56, %v270_v56  ;;  %v276_v18 = vmul.f32 1.0201395, %v260_v47  ;;  %v393_v19 = vmul.f32 1.0201395, %v377_v36  ;;  %v288_v20 = vmul.f32 %v272_v49, %v272_v49 }
  0xd1   :  { %v394_v21 = vmul.f32 1.0201395, %v378_v57  ;;  %v381_v40 = vsub.f32 %v1069_v43, %v1100_v6  ;;  %v383_v1 = vsub.f32 %v1094_v22, %v1100_v6  ;;  %v296_v12 = vsub.f32 %v164_v27, %v280_v28 }
  0xd2   :  { %v290_v48 = vmul.f32 %v274_v30, %v274_v30  ;;  %v395_v35 = vmul.f32 1.0201395, %v379_v0  ;;  %v396_v29 = vmul.f32 1.0201395, %v380_v5  ;;  %v1191_v33 = vsub.f32 %v166_v34, %v282_v10 }
  0xd3   :  { %v1146_v60 = vpop.permute.xlu1 %338  ;;  %v1148_v62 = vpop.permute.xlu0 %350  ;;  %v1193_v46 = vsub.f32 %v168_v2, %v284_v11  ;;  %v382_v50 = vsub.f32 %v1118_v23, %v1100_v6  ;;  %v385_v49 = vsub.f32 %v1120_v31, %v1100_v6  ;;  %v1199_v56 = vsub.f32 %v170_v41, %v286_v15 }
  0xd4   :  { %v292_v22 = vmul.f32 %v276_v18, %v276_v18  ;;  %v409_v28 = vmul.f32 %v393_v19, %v393_v19  ;;  %v1202_v30 = vsub.f32 %v172_v55, %v288_v20  ;;  %v410_v44 = vmul.f32 %v394_v21, %v394_v21 }
  0xd5   :  { %v397_v34 = vmul.f32 1.0201395, %v381_v40  ;;  %v399_v38 = vmul.f32 1.0201395, %v383_v1  ;;  %v1204_v2 = vsub.f32 %v174_v42, %v290_v48  ;;  %v1206_v47 = vmul.f32 %v395_v35, %v395_v35 }
  0xd6   :  { %v412_v23 = vmul.f32 %v396_v29, %v396_v29  ;;  %v398_v31 = vmul.f32 1.0201395, %v382_v50  ;;  %v401_v41 = vmul.f32 1.0201395, %v385_v49  ;;  %v384_v0 = vsub.f32 %v1146_v60, %v1100_v6 }
  0xd7   :  { %v1167_v51 = vpop.permute.xlu1 %346  ;;  %v1169_v52 = vpop.permute.xlu0 %358  ;;  %v387_v55 = vsub.f32 %v1148_v62, %v1100_v6  ;;  %v1214_v10 = vsub.f32 %v176_v26, %v292_v22  ;;  %v425_v11 = vsub.f32 %v293_v14, %v409_v28  ;;  %v426_v29 = vsub.f32 %v1005_v61, %v410_v44 }
  0xd8   :  { %v1218_v42 = vmul.f32 %v397_v34, %v397_v34  ;;  %v1220_v15 = vmul.f32 %v399_v38, %v399_v38  ;;  %v386_v18 = vsub.f32 %v1167_v51, %v1100_v6  ;;  %v427_v60 = vsub.f32 %v1011_v7, %v1206_v47 }
  0xd9   :  { %v428_v62 = vsub.f32 %v296_v12, %v412_v23  ;;  %v414_v20 = vmul.f32 %v398_v31, %v398_v31  ;;  %v1226_v14 = vmul.f32 %v401_v41, %v401_v41  ;;  %v400_v21 = vmul.f32 1.0201395, %v384_v0 }
  0xda   :  { %v403_v40 = vmul.f32 1.0201395, %v387_v55  ;;  %v429_v51 = vsub.f32 %v1017_v17, %v1218_v42  ;;  %v431_v7 = vsub.f32 %v1023_v39, %v1220_v15  ;;  %v402_v12 = vmul.f32 1.0201395, %v386_v18 }
  0xdb   :  { %v1181_v24 = vpop.permute.xlu1 %354  ;;  %v1183_v45 = vpop.permute.xlu0 %366  ;;  %v430_v38 = vsub.f32 %v1191_v33, %v414_v20  ;;  %v433_v47 = vsub.f32 %v1030_v53, %v1226_v14  ;;  %v416_v23 = vmul.f32 %v400_v21, %v400_v21  ;;  %vm632_vm10 = vcmp.eq.s32.totalorder %v1139_v54, %v1040_v3 }
  0xdc   :  { %v388_v28 = vsub.f32 %v1181_v24, %v1100_v6  ;;  %v418_v24 = vmul.f32 %v402_v12, %v402_v12  ;;  %vm637_vm11 = vcmp.eq.s32.totalorder %v1142_v37, %v1040_v3 }
  0xdf   :  { %v1189_v25 = vpop.permute.xlu1 %362 }
  0xe0   :  { %v443_v43 = vpop.permute.xlu0 %442 }
  0xe1   :  { %v509_v27 = vsub.f32 %v443_v43, %v1123_v32 }
  0xe3   :  { %v525_v36 = vmul.f32 1.0201395, %v509_v27  ;;  %v1208_v57 = vpop.permute.xlu1 %370 }
  0xe4   :  { %v455_v5 = vpop.permute.xlu0 %454 }
  0xe5   :  { %v541_v48 = vmul.f32 %v525_v36, %v525_v36  ;;  %v512_v35 = vsub.f32 %v455_v5, %v1123_v32  ;;  %v1239_v36 = vmul.f32 %v403_v40, %v403_v40 }
  0xe7   :  { %v557_v19 = vsub.f32 %v425_v11, %v541_v48  ;;  %v528_v26 = vmul.f32 1.0201395, %v512_v35  ;;  %v389_v11 = vsub.f32 %v1169_v52, %v1100_v6  ;;  %v404_v48 = vmul.f32 1.0201395, %v388_v28 }
  0xe8   :  { %v447_v1 = vpop.permute.xlu1 %446  ;;  %v463_v61 = vpop.permute.xlu0 %462 }
  0xe9   :  { %v573_v50 = vmul.f32 1.442695, %v557_v19  ;;  %v544_v49 = vmul.f32 %v528_v26, %v528_v26  ;;  %v510_v43 = vsub.f32 %v447_v1, %v1123_v32  ;;  %v514_v22 = vsub.f32 %v463_v61, %v1123_v32 }
  0xea   :  { %v435_v19 = vsub.f32 %v1035_v63, %v1239_v36  ;;  %v390_v26 = vsub.f32 %v1189_v25, %v1100_v6  ;;  %v1345_v36 = vmov 0.0  }
  0xeb   :  { %768 = vpow2.f32 %v573_v50  ;;  %v560_v27 = vsub.f32 %v428_v62, %v544_v49  ;;  %v526_v44 = vmul.f32 1.0201395, %v510_v43  ;;  %v530_v34 = vmul.f32 1.0201395, %v514_v22 }
  0xec   :  { %v451_v17 = vpop.permute.xlu1 %450  ;;  %v471_v31 = vpop.permute.xlu0 %470  ;;  %v432_v62 = vsub.f32 %v1193_v46, %v416_v23  ;;  %v1252_v49 = vmul.f32 1.0201395, %v389_v11  ;;  %v420_v22 = vmul.f32 %v404_v48, %v404_v48  ;;  %v406_v25 = vmul.f32 1.0201395, %v390_v26 }
  0xed   :  { %v579_v41 = vmul.f32 1.442695, %v560_v27  ;;  %v542_v0 = vmul.f32 %v526_v44, %v526_v44  ;;  %v546_v55 = vmul.f32 %v530_v34, %v530_v34  ;;  %v511_v5 = vsub.f32 %v451_v17, %v1123_v32 }
  0xee   :  { %v516_v33 = vsub.f32 %v471_v31, %v1123_v32 }
  0xef   :  { %770 = vpow2.f32 %v579_v41  ;;  %v558_v35 = vsub.f32 %v426_v29, %v542_v0  ;;  %v562_v42 = vsub.f32 %v430_v38, %v546_v55  ;;  %v527_v18 = vmul.f32 1.0201395, %v511_v5 }
  0xf0   :  { %v532_v20 = vmul.f32 1.0201395, %v516_v33  ;;  %v459_v21 = vpop.permute.xlu1 %458  ;;  %v479_v40 = vpop.permute.xlu0 %478  ;;  %v434_v29 = vsub.f32 %v1199_v56, %v418_v24  ;;  %v392_v55 = vsub.f32 %v1208_v57, %v1100_v6  ;;  %v436_v33 = vsub.f32 %v1202_v30, %v420_v22 }
  0xf1   :  { %v575_v1 = vmul.f32 1.442695, %v558_v35  ;;  %v583_v52 = vmul.f32 1.442695, %v562_v42  ;;  %v543_v61 = vmul.f32 %v527_v18, %v527_v18  ;;  %v513_v50 = vsub.f32 %v459_v21, %v1123_v32 }
  0xf2   :  { %v548_v43 = vmul.f32 %v532_v20, %v532_v20  ;;  %v518_v46 = vsub.f32 %v479_v40, %v1123_v32  ;;  %v422_v35 = vmul.f32 %v406_v25, %v406_v25  ;;  %v408_v40 = vmul.f32 1.0201395, %v392_v55 }
  0xf3   :  { %772 = vpow2.f32 %v575_v1  ;;  %v559_v12 = vsub.f32 %v427_v60, %v543_v61  ;;  %v529_v28 = vmul.f32 1.0201395, %v513_v50 }
  0xf4   :  { %774 = vpow2.f32 %v583_v52  ;;  %v564_v27 = vsub.f32 %v432_v62, %v548_v43  ;;  %v534_v44 = vmul.f32 1.0201395, %v518_v46  ;;  %v467_v34 = vpop.permute.xlu1 %466  ;;  %v487_v38 = vpop.permute.xlu0 %486 }
  0xf5   :  { %v769_v23 = vpop.eup %768  ;;  %v577_v17 = vmul.f32 1.442695, %v559_v12  ;;  %v545_v31 = vmul.f32 %v529_v28, %v529_v28  ;;  %v515_v56 = vsub.f32 %v467_v34, %v1123_v32  ;;  %v520_v41 = vsub.f32 %v487_v38, %v1123_v32 }
  0xf6   :  { %v688_v0 = vadd.f32 %v769_v23, %v1082_v58  ;;  %v587_v60 = vmul.f32 1.442695, %v564_v27  ;;  %v550_v5 = vmul.f32 %v534_v44, %v534_v44  ;;  %v424_v27 = vmul.f32 %v408_v40, %v408_v40 }
  0xf7   :  { %776 = vpow2.f32 %v577_v17  ;;  %v561_v24 = vsub.f32 %v429_v51, %v545_v31  ;;  %v531_v11 = vmul.f32 1.0201395, %v515_v56  ;;  %v536_v48 = vmul.f32 1.0201395, %v520_v41 }
  0xf8   :  { %704 = vst [vmem:[#allocation2] sm:$0xff] %v688_v0  ;;  %778 = vpow2.f32 %v587_v60  ;;  %v566_v42 = vsub.f32 %v434_v29, %v550_v5  ;;  %v475_v18 = vpop.permute.xlu1 %474  ;;  %v495_v62 = vpop.permute.xlu0 %494  ;;  %v391_v29 = vsub.f32 %v1183_v45, %v1100_v6  ;;  %v421_v23 = vmul.f32 %v1252_v49, %v1252_v49 }
  0xf9   :  { %v771_v26 = vpop.eup %770  ;;  %v581_v20 = vmul.f32 1.442695, %v561_v24  ;;  %v547_v58 = vmul.f32 %v531_v11, %v531_v11  ;;  %v552_v21 = vmul.f32 %v536_v48, %v536_v48  ;;  %v517_v57 = vsub.f32 %v475_v18, %v1123_v32 }
  0xfa   :  { %v691_v1 = vadd.f32 %v771_v26, %v1084_v59  ;;  %v591_v51 = vmul.f32 1.442695, %v566_v42  ;;  %v522_v52 = vsub.f32 %v495_v62, %v1123_v32  ;;  %v438_v59 = vsub.f32 %v1204_v2, %v422_v35 }
  0xfb   :  { %780 = vpow2.f32 %v581_v20  ;;  %v563_v30 = vsub.f32 %v431_v7, %v547_v58  ;;  %v568_v61 = vsub.f32 %v436_v33, %v552_v21  ;;  %v533_v50 = vmul.f32 1.0201395, %v517_v57  ;;  %v1343_v33 = vld [vmem:[#allocation5_spill] sm:$0xff]  ;;  %v1344_v58 = vld [vmem:[#allocation7_spill] sm:$0xff]  ;;  %v1346_v57 = vld [vmem:[#allocation8_spill] sm:$0xff] }
  0xfc   :  { %707 = vst [vmem:[#allocation2 + $0x18] sm:$0xff] %v691_v1  ;;  %782 = vpow2.f32 %v591_v51  ;;  %v538_v43 = vmul.f32 1.0201395, %v522_v52  ;;  %v483_v46 = vpop.permute.xlu1 %482  ;;  %v503_v22 = vpop.permute.xlu0 %502  ;;  %v407_v41 = vmul.f32 1.0201395, %v391_v29  ;;  %v440_v53 = vsub.f32 %v1214_v10, %v424_v27 }
  0xfd   :  { %v773_v39 = vpop.eup %772  ;;  %v585_v15 = vmul.f32 1.442695, %v563_v30  ;;  %v595_v7 = vmul.f32 1.442695, %v568_v61  ;;  %v549_v12 = vmul.f32 %v533_v50, %v533_v50  ;;  %v519_v28 = vsub.f32 %v483_v46, %v1123_v32  ;;  %v1348_v30 = vld [vmem:[#allocation6_spill] sm:$0xff] }
  0xfe   :  { %v775_v25 = vpop.eup %774  ;;  %v689_v44 = vadd.f32 %v773_v39, %v1096_v4  ;;  %v554_v34 = vmul.f32 %v538_v43, %v538_v43  ;;  %v524_v6 = vsub.f32 %v503_v22, %v1123_v32  ;;  %v437_v48 = vsub.f32 %v1046_v13, %v421_v23  ;;  %v1350_v39 = vld [vmem:[#allocation10_spill] sm:$0xff] }
  0xff   :  { %v693_v45 = vadd.f32 %v775_v25, %v1102_v8  ;;  %784 = vpow2.f32 %v585_v15  ;;  %v565_v2 = vsub.f32 %v433_v47, %v549_v12  ;;  %v535_v38 = vmul.f32 1.0201395, %v519_v28 }
 0x100   :  { %705 = vst [vmem:[#allocation2 + $0x8] sm:$0xff] %v689_v44  ;;  %786 = vpow2.f32 %v595_v7  ;;  %v570_v17 = vsub.f32 %v438_v59, %v554_v34  ;;  %v540_v31 = vmul.f32 1.0201395, %v524_v6  ;;  %v491_v56 = vpop.permute.xlu1 %490  ;;  %v621_v35 = vadd.s32 120, %v1343_v33  ;;  %v1349_v59 = vld [vmem:[#allocation9_spill] sm:$0xff] }
 0x101   :  { %v777_v4 = vpop.eup %776  ;;  %709 = vst [vmem:[#allocation2 + $0x28] sm:$0xff] %v693_v45  ;;  %v589_v0 = vmul.f32 1.442695, %v565_v2  ;;  %v551_v55 = vmul.f32 %v535_v38, %v535_v38  ;;  %v521_v8 = vsub.f32 %v491_v56, %v1123_v32  ;;  %v744_v13 = vsel %vm632_vm10, 1.0, %v1345_v36 }
 0x102   :  { %v779_v60 = vpop.eup %778  ;;  %v690_v14 = vadd.f32 %v777_v4, %v1104_v9  ;;  %v599_v47 = vmul.f32 1.442695, %v570_v17  ;;  %v556_v5 = vmul.f32 %v540_v31, %v540_v31  ;;  %v423_v9 = vmul.f32 %v407_v41, %v407_v41 }
 0x103   :  { %v695_v49 = vadd.f32 %v779_v60, %v1115_v16  ;;  %788 = vpow2.f32 %v589_v0  ;;  %v567_v24 = vsub.f32 %v435_v19, %v551_v55  ;;  %v537_v11 = vmul.f32 1.0201395, %v521_v8 }
 0x104   :  { %706 = vst [vmem:[#allocation2 + $0x10] sm:$0xff] %v690_v14  ;;  %790 = vpow2.f32 %v599_v47  ;;  %v572_v42 = vsub.f32 %v440_v53, %v556_v5  ;;  %v499_v10 = vpop.permute.xlu1 %498  ;;  %v749_v19 = vsel %vm637_vm11, 1.0, %v1345_v36  ;;  %v618_v52 = vadd.s32 96, %v1343_v33 }
 0x105   :  { %v781_v18 = vpop.eup %780  ;;  %711 = vst [vmem:[#allocation2 + $0x38] sm:$0xff] %v695_v49  ;;  %v593_v62 = vmul.f32 1.442695, %v567_v24  ;;  %v553_v26 = vmul.f32 %v537_v11, %v537_v11  ;;  %v523_v16 = vsub.f32 %v499_v10, %v1123_v32  ;;  %v1347_v32 = vld [vmem:[#allocation11_spill] sm:$0xff]  ;;  %v439_v61 = vsub.f32 %v1348_v30, %v423_v9 }
 0x106   :  { %v783_v20 = vpop.eup %782  ;;  %v692_v63 = vadd.f32 %v781_v18, %v1344_v58  ;;  %v603_v21 = vmul.f32 1.442695, %v572_v42  ;;  %vm634_vm12 = vcmp.eq.s32.totalorder %v1347_v32, %v1040_v3  ;;  %vm639_vm13 = vcmp.eq.s32.totalorder %v621_v35, %v1040_v3 }
 0x107   :  { %v697_v40 = vadd.f32 %v783_v20, %v1346_v57  ;;  %792 = vpow2.f32 %v593_v62  ;;  %v569_v1 = vsub.f32 %v437_v48, %v553_v26  ;;  %v539_v51 = vmul.f32 1.0201395, %v523_v16 }
 0x108   :  { %708 = vst [vmem:[#allocation2 + $0x20] sm:$0xff] %v692_v63  ;;  %794 = vpow2.f32 %v603_v21  ;;  %v680_v46 = vmul.f32 0.001, %v744_v13  ;;  %v685_v22 = vmul.f32 0.001, %v749_v19  ;;  %v746_v7 = vsel %vm634_vm12, 1.0, %v1345_v36 }
 0x109   :  { %v785_v54 = vpop.eup %784  ;;  %713 = vst [vmem:[#allocation2 + $0x48] sm:$0xff] %v697_v40  ;;  %v597_v37 = vmul.f32 1.442695, %v569_v1  ;;  %v555_v50 = vmul.f32 %v539_v51, %v539_v51  ;;  %v751_v28 = vsel %vm639_vm13, 1.0, %v1345_v36  ;;  %vm636_vm14 = vcmp.eq.s32.totalorder %v618_v52, %v1040_v3 }
 0x10a   :  { %v787_v29 = vpop.eup %786  ;;  %v694_v43 = vadd.f32 %v785_v54, %v1349_v59  ;;  %v620_v25 = vadd.s32 112, %v1343_v33  ;;  %v682_v45 = vmul.f32 0.001, %v746_v7  ;;  %v687_v38 = vmul.f32 0.001, %v751_v28 }
 0x10b   :  { %v699_v15 = vadd.f32 %v787_v29, %v1350_v39  ;;  %796 = vpow2.f32 %v597_v37  ;;  %v571_v12 = vsub.f32 %v439_v61, %v555_v50  ;;  %v748_v23 = vsel %vm636_vm14, 1.0, %v1345_v36 }
 0x10c   :  { %710 = vst [vmem:[#allocation2 + $0x30] sm:$0xff] %v694_v43  ;;  %vm638_vm15 = vcmp.eq.s32.totalorder %v620_v25, %v1040_v3  ;;  %v684_v4 = vmul.f32 0.001, %v748_v23 }
 0x10d   :  { %v789_v27 = vpop.eup %788  ;;  %715 = vst [vmem:[#allocation2 + $0x58] sm:$0xff] %v699_v15  ;;  %v601_v44 = vmul.f32 1.442695, %v571_v12  ;;  %v750_v0 = vsel %vm638_vm15, 1.0, %v1345_v36 }
 0x10e   :  { %v791_v34 = vpop.eup %790  ;;  %v696_v6 = vadd.f32 %v789_v27, %v680_v46  ;;  %v686_v60 = vmul.f32 0.001, %v750_v0 }
 0x10f   :  { %v701_v2 = vadd.f32 %v791_v34, %v685_v22  ;;  %798 = vpow2.f32 %v601_v44 }
 0x110   :  { %712 = vst [vmem:[#allocation2 + $0x40] sm:$0xff] %v696_v6 }
 0x111   :  { %v793_v17 = vpop.eup %792  ;;  %717 = vst [vmem:[#allocation2 + $0x68] sm:$0xff] %v701_v2 }
 0x112   :  { %v795_v31 = vpop.eup %794  ;;  %v698_v56 = vadd.f32 %v793_v17, %v682_v45 }
 0x113   :  { %v703_v41 = vadd.f32 %v795_v31, %v687_v38 }
 0x114   :  { %714 = vst [vmem:[#allocation2 + $0x50] sm:$0xff] %v698_v56 }
 0x115   :  { %v797_v55 = vpop.eup %796  ;;  %719 = vst [vmem:[#allocation2 + $0x78] sm:$0xff] %v703_v41 }
 0x116   :  { %v700_v8 = vadd.f32 %v797_v55, %v684_v4 }
 0x118   :  { %716 = vst [vmem:[#allocation2 + $0x60] sm:$0xff] %v700_v8 }
 0x119   :  { %v799_v53 = vpop.eup %798 }
 0x11a   :  { %v702_v14 = vadd.f32 %v799_v53, %v686_v60 }
 0x11c   :  { %718 = vst [vmem:[#allocation2 + $0x70] sm:$0xff] %v702_v14 }
 0x11d   :  { %811 = shalt.err (!%p808_p4)
}
 0x11e   :  { %s812_s18 = scalar_lea.hbm %s1331_s2, 2048 }
 0x11f   :  { %p813_p5 = scmp.ne.s32.totalorder %s1331_s2, %s812_s18  ;;  %p816_p6 = scmp.lt.u32.totalorder %s812_s18, %s1331_s2 }
 0x121   :  { %p818_p7 = pnand %p816_p6, %p813_p5 }
 0x123   :  { %821 = shalt.err (!%p818_p7)
}
 0x124   :  { %s830_s23 = smov 128   ;;  %s831_s24 = smov 8  }
 0x125   :  { %731 = dma.vmem_to_hbm [thread:$0]  %s726_s14, 2048, %s1331_s2, [#allocation3], %s830_s23, %s830_s23, %s831_s24  }
 0x126   :  { %822 = dma.done.wait [#allocation3], 2048  }
 0x127   :  { %823 = vsyncadd [#allocation3], 4294965248 }
 0x128   :  { %735 = vsyncpa [#allocation3], 1 }

</bundles_post_ra>
